<compile_context>
chip_gen: v7x
topology: tpu7x:2x2x1
jax: 0.10.0
libtpu: 0.0.40
codegen_flags: <defaults>
</compile_context>

<pallas_src>
import functools

import jax
import jax.numpy as jnp
from jax.experimental import pallas as pl
from jax.experimental.pallas import tpu as pltpu

NEG_SLOPE = 0.01        # PyTorch nn.LeakyReLU default negative_slope
HIDDEN_DIMS = (10, 7, 5, 7, 10)
NUM_LAYERS = 6
LANE = 128


def _round_up(n, m):
    return ((n + m - 1) // m) * m


def _cdiv(a, b):
    return -(-a // b)


def packing_dims(input_dim):
    """Slot width S, rows-per-lane-row R, packed lane width L (multiple of 128)."""
    dims = [input_dim, *HIDDEN_DIMS, input_dim]
    S = max(dims)                      # per-row feature slot (holds every layer's width)
    R = max(1, LANE // S)              # batch rows packed side-by-side along lanes
    L = _round_up(R * S, LANE)         # packed lane width
    return S, R, L


def autoencoder_kernel(x_ref, w_ref, b_ref, o_ref):
    # x_ref: (TB, L)   w_ref: (6, L, L)   b_ref: (6, 1, L)   o_ref: (TB, L)
    mxu_dtype = w_ref.dtype
    h = x_ref[...].astype(mxu_dtype)

    # 5 x (Linear + LeakyReLU). Block-diagonal padded weights keep padded columns at 0.
    for i in range(NUM_LAYERS - 1):
        acc = jnp.dot(h, w_ref[i], preferred_element_type=jnp.float32)
        acc = acc + b_ref[i].astype(jnp.float32)
        acc = jnp.maximum(acc, NEG_SLOPE * acc)        # LeakyReLU
        h = acc.astype(mxu_dtype)

    # Final Linear + Sigmoid (exp goes to the EUP slot).
    acc = jnp.dot(h, w_ref[NUM_LAYERS - 1], preferred_element_type=jnp.float32)
    acc = acc + b_ref[NUM_LAYERS - 1].astype(jnp.float32)
    o_ref[...] = jax.nn.sigmoid(acc).astype(o_ref.dtype)


def init_params(key, input_dim):
    """Deterministic init mimicking torch.nn.Linear default U[-1/sqrt(in), 1/sqrt(in)].
    Weights are returned already transposed to (in_features, out_features)."""
    dims = [input_dim, *HIDDEN_DIMS, input_dim]
    params = []
    for i in range(NUM_LAYERS):
        fan_in, fan_out = dims[i], dims[i + 1]
        key, kw, kb = jax.random.split(key, 3)
        bound = 1.0 / (fan_in ** 0.5)
        w = jax.random.uniform(kw, (fan_in, fan_out), jnp.float32, -bound, bound)
        b = jax.random.uniform(kb, (1, fan_out), jnp.float32, -bound, bound)
        params.append((w, b))
    return params


def pack_params(params, input_dim, dtype=jnp.float32):
    """Pack the 6 (W, b) pairs into block-diagonal lane-dense slabs.

    Each layer's weight is placed R times on the diagonal of an (L, L) matrix so that
    R batch rows packed along the lane axis are transformed independently."""
    S, R, L = packing_dims(input_dim)
    w_slab = jnp.zeros((NUM_LAYERS, L, L), dtype)
    b_slab = jnp.zeros((NUM_LAYERS, 1, L), dtype)
    for i, (w, b) in enumerate(params):
        fi, fo = w.shape
        wc = w.astype(dtype)
        bc = b.reshape(-1).astype(dtype)
        for r in range(R):
            w_slab = w_slab.at[i, r * S:r * S + fi, r * S:r * S + fo].set(wc)
            b_slab = b_slab.at[i, 0, r * S:r * S + fo].set(bc)
    return w_slab, b_slab


@functools.partial(jax.jit, static_argnames=("block_rows",))
def autoencoder_forward(x, w_slab, b_slab, *, block_rows=8192):
    batch, input_dim = x.shape
    S, R, L = packing_dims(input_dim)
    assert w_slab.shape == (NUM_LAYERS, L, L), "slab does not match input_dim packing"

    # Sublane granularity for the streamed row-tile depends on the element size
    # (8 rows/vreg for 32-bit, 16 for 16-bit, 32 for 8-bit types).
    itemsize = jnp.dtype(x.dtype).itemsize
    gran = {4: 8, 2: 16, 1: 32}.get(itemsize, 32)

    # 1) Pad feature columns up to the slot width.
    xp = x if input_dim == S else jnp.pad(x, ((0, 0), (0, S - input_dim)))

    # 2) Pack R batch rows per lane-row (free contiguous reshape) and pad lanes to L.
    b1 = _round_up(batch, R)
    if b1 != batch:
        xp = jnp.pad(xp, ((0, b1 - batch), (0, 0)))
    P = b1 // R
    xp = xp.reshape(P, R * S)
    if R * S != L:
        xp = jnp.pad(xp, ((0, 0), (0, L - R * S)))

    # 3) Packed-row tile: large (amortizes ~0.35us/step overhead), rounded to the
    #    sublane granularity, clamped for small batches.
    tb = max(gran, (min(block_rows, _round_up(P, gran)) // gran) * gran)
    # Ensure >= 2 balanced grid steps when everything would fit one tile, so the
    # "parallel" axis can be sharded across both TensorCores on v7x.
    if tb >= P and P >= 2 * gran:
        tb = _round_up(_cdiv(P, 2), gran)
    Pp = _round_up(P, tb)
    if Pp != P:
        xp = jnp.pad(xp, ((0, Pp - P), (0, 0)))

    grid = (Pp // tb,)

    out = pl.pallas_call(
        autoencoder_kernel,
        out_shape=jax.ShapeDtypeStruct((Pp, L), x.dtype),
        grid=grid,
        in_specs=[
            pl.BlockSpec((tb, L), lambda i: (i, 0)),                   # streamed x tiles
            pl.BlockSpec((NUM_LAYERS, L, L), lambda i: (0, 0, 0)),     # weight slab (resident)
            pl.BlockSpec((NUM_LAYERS, 1, L), lambda i: (0, 0, 0)),     # bias slab (resident)
        ],
        out_specs=pl.BlockSpec((tb, L), lambda i: (i, 0)),
        compiler_params=pltpu.CompilerParams(
            dimension_semantics=("parallel",),       # megacore sharding on v7x
            vmem_limit_bytes=48 * 1024 * 1024,       # headroom for big tiles on v5e
        ),
    )(xp, w_slab, b_slab)

    # 4) Unpack: drop padded lanes / packed-row padding, restore (batch, input_dim).
    out = out[:P, :R * S].reshape(b1, S)
    return out[:batch, :input_dim]


def reference_forward(x, params):
    """Pure-JAX reference for correctness check."""
    h = x
    for i, (w, b) in enumerate(params):
        h = jnp.dot(h, w) + b
        if i < NUM_LAYERS - 1:
            h = jnp.where(h > 0, h, NEG_SLOPE * h)
        else:
            h = jax.nn.sigmoid(h)
    return h


if __name__ == "__main__":
    key = jax.random.PRNGKey(0)
    k_in, k_params = jax.random.split(key)

    batch, input_dim = 8, 32
    x = jax.random.normal(k_in, (batch, input_dim), dtype=jnp.float32)
    params = init_params(k_params, input_dim)
    ref = reference_forward(x, params)

    # f32 path
    w_slab, b_slab = pack_params(params, input_dim, jnp.float32)
    out = jax.block_until_ready(autoencoder_forward(x, w_slab, b_slab))
    assert out.shape == (batch, input_dim)
    assert jnp.allclose(out, ref, atol=1e-5, rtol=1e-5), "f32 Pallas output mismatch vs reference"

    # bf16 slab path (bf16 operands straight into the MXU, f32 accumulation in-kernel)
    wb, bb = pack_params(params, input_dim, jnp.bfloat16)
    out_bf16 = jax.block_until_ready(
        autoencoder_forward(x.astype(jnp.bfloat16), wb, bb))
    assert jnp.allclose(out_bf16.astype(jnp.float32), ref, atol=5e-2, rtol=5e-2), \
        "bf16 Pallas output mismatch vs reference"

    # Larger ragged batch: exercises row packing (1000 % 4 != 0), lane-dense tiles,
    # the >=2-step megacore split and batch padding.
    xl = jax.random.normal(jax.random.PRNGKey(1), (1000, input_dim), dtype=jnp.float32)
    out_l = jax.block_until_ready(
        autoencoder_forward(xl, w_slab, b_slab, block_rows=256))
    ref_l = reference_forward(xl, params)
    assert out_l.shape == xl.shape
    assert jnp.allclose(out_l, ref_l, atol=1e-5, rtol=1e-5), "tiled Pallas output mismatch vs reference"

    print("KERNEL_OK")
</pallas_src>

<mosaic_0001>
module attributes {stable_mosaic.version = 11 : i64} {
  func.func @autoencoder_kernel(%arg0: i32, %arg1: memref<8x128xf32, #tpu.memory_space<vmem>>, %arg2: memref<6x128x128xf32, #tpu.memory_space<vmem>>, %arg3: memref<6x1x128xf32, #tpu.memory_space<vmem>>, %arg4: memref<8x128xf32, #tpu.memory_space<vmem>>) attributes {dimension_semantics = [#tpu.dimension_semantics<parallel>], iteration_bounds = array<i64: 1>, scalar_prefetch = 0 : i64, scratch_operands = 0 : i64, tpu.core_type = #tpu.core_type<tc>, window_params = [{transform_indices = @transform_0, window_bounds = array<i64: 8, 128>}, {pipeline_mode = #tpu.pipeline_mode<synchronous>, transform_indices = @transform_1, window_bounds = array<i64: 6, 128, 128>}, {pipeline_mode = #tpu.pipeline_mode<synchronous>, transform_indices = @transform_2, window_bounds = array<i64: 6, 1, 128>}, {transform_indices = @transform_3, window_bounds = array<i64: 8, 128>}]} {
    %c0 = arith.constant 0 : index
    %c0_0 = arith.constant 0 : index
    %0 = vector.load %arg1[%c0, %c0_0] : memref<8x128xf32, #tpu.memory_space<vmem>>, vector<8x128xf32>
    %c0_1 = arith.constant 0 : index
    %c0_2 = arith.constant 0 : index
    %c0_3 = arith.constant 0 : index
    %1 = vector.load %arg2[%c0_1, %c0_2, %c0_3] : memref<6x128x128xf32, #tpu.memory_space<vmem>>, vector<1x128x128xf32>
    %2 = vector.shape_cast %1 : vector<1x128x128xf32> to vector<128x128xf32>
    %cst = arith.constant dense<0.000000e+00> : vector<8x128xf32>
    %3 = tpu.matmul %0, %2, %cst {dimension_numbers = #tpu.dot_dimension_numbers<[1], [0], [0], [1], [0, 0, 1, 1], [], []>} : vector<8x128xf32>, vector<128x128xf32>, vector<8x128xf32> -> vector<8x128xf32>
    %c0_4 = arith.constant 0 : index
    %c0_5 = arith.constant 0 : index
    %c0_6 = arith.constant 0 : index
    %4 = vector.load %arg3[%c0_4, %c0_5, %c0_6] : memref<6x1x128xf32, #tpu.memory_space<vmem>>, vector<1x1x128xf32>
    %5 = vector.shape_cast %4 : vector<1x1x128xf32> to vector<1x128xf32>
    %6 = vector.broadcast %5 : vector<1x128xf32> to vector<8x128xf32>
    %7 = arith.addf %3, %6 : vector<8x128xf32>
    %cst_7 = arith.constant 0.00999999977 : f32
    %8 = vector.broadcast %cst_7 : f32 to vector<8x128xf32>
    %9 = arith.mulf %8, %7 : vector<8x128xf32>
    %10 = arith.maximumf %7, %9 : vector<8x128xf32>
    %c1 = arith.constant 1 : index
    %c0_8 = arith.constant 0 : index
    %c0_9 = arith.constant 0 : index
    %11 = vector.load %arg2[%c1, %c0_8, %c0_9] : memref<6x128x128xf32, #tpu.memory_space<vmem>>, vector<1x128x128xf32>
    %12 = vector.shape_cast %11 : vector<1x128x128xf32> to vector<128x128xf32>
    %cst_10 = arith.constant dense<0.000000e+00> : vector<8x128xf32>
    %13 = tpu.matmul %10, %12, %cst_10 {dimension_numbers = #tpu.dot_dimension_numbers<[1], [0], [0], [1], [0, 0, 1, 1], [], []>} : vector<8x128xf32>, vector<128x128xf32>, vector<8x128xf32> -> vector<8x128xf32>
    %c1_11 = arith.constant 1 : index
    %c0_12 = arith.constant 0 : index
    %c0_13 = arith.constant 0 : index
    %14 = vector.load %arg3[%c1_11, %c0_12, %c0_13] : memref<6x1x128xf32, #tpu.memory_space<vmem>>, vector<1x1x128xf32>
    %15 = vector.shape_cast %14 : vector<1x1x128xf32> to vector<1x128xf32>
    %16 = vector.broadcast %15 : vector<1x128xf32> to vector<8x128xf32>
    %17 = arith.addf %13, %16 : vector<8x128xf32>
    %cst_14 = arith.constant 0.00999999977 : f32
    %18 = vector.broadcast %cst_14 : f32 to vector<8x128xf32>
    %19 = arith.mulf %18, %17 : vector<8x128xf32>
    %20 = arith.maximumf %17, %19 : vector<8x128xf32>
    %c2 = arith.constant 2 : index
    %c0_15 = arith.constant 0 : index
    %c0_16 = arith.constant 0 : index
    %21 = vector.load %arg2[%c2, %c0_15, %c0_16] : memref<6x128x128xf32, #tpu.memory_space<vmem>>, vector<1x128x128xf32>
    %22 = vector.shape_cast %21 : vector<1x128x128xf32> to vector<128x128xf32>
    %cst_17 = arith.constant dense<0.000000e+00> : vector<8x128xf32>
    %23 = tpu.matmul %20, %22, %cst_17 {dimension_numbers = #tpu.dot_dimension_numbers<[1], [0], [0], [1], [0, 0, 1, 1], [], []>} : vector<8x128xf32>, vector<128x128xf32>, vector<8x128xf32> -> vector<8x128xf32>
    %c2_18 = arith.constant 2 : index
    %c0_19 = arith.constant 0 : index
    %c0_20 = arith.constant 0 : index
    %24 = vector.load %arg3[%c2_18, %c0_19, %c0_20] : memref<6x1x128xf32, #tpu.memory_space<vmem>>, vector<1x1x128xf32>
    %25 = vector.shape_cast %24 : vector<1x1x128xf32> to vector<1x128xf32>
    %26 = vector.broadcast %25 : vector<1x128xf32> to vector<8x128xf32>
    %27 = arith.addf %23, %26 : vector<8x128xf32>
    %cst_21 = arith.constant 0.00999999977 : f32
    %28 = vector.broadcast %cst_21 : f32 to vector<8x128xf32>
    %29 = arith.mulf %28, %27 : vector<8x128xf32>
    %30 = arith.maximumf %27, %29 : vector<8x128xf32>
    %c3 = arith.constant 3 : index
    %c0_22 = arith.constant 0 : index
    %c0_23 = arith.constant 0 : index
    %31 = vector.load %arg2[%c3, %c0_22, %c0_23] : memref<6x128x128xf32, #tpu.memory_space<vmem>>, vector<1x128x128xf32>
    %32 = vector.shape_cast %31 : vector<1x128x128xf32> to vector<128x128xf32>
    %cst_24 = arith.constant dense<0.000000e+00> : vector<8x128xf32>
    %33 = tpu.matmul %30, %32, %cst_24 {dimension_numbers = #tpu.dot_dimension_numbers<[1], [0], [0], [1], [0, 0, 1, 1], [], []>} : vector<8x128xf32>, vector<128x128xf32>, vector<8x128xf32> -> vector<8x128xf32>
    %c3_25 = arith.constant 3 : index
    %c0_26 = arith.constant 0 : index
    %c0_27 = arith.constant 0 : index
    %34 = vector.load %arg3[%c3_25, %c0_26, %c0_27] : memref<6x1x128xf32, #tpu.memory_space<vmem>>, vector<1x1x128xf32>
    %35 = vector.shape_cast %34 : vector<1x1x128xf32> to vector<1x128xf32>
    %36 = vector.broadcast %35 : vector<1x128xf32> to vector<8x128xf32>
    %37 = arith.addf %33, %36 : vector<8x128xf32>
    %cst_28 = arith.constant 0.00999999977 : f32
    %38 = vector.broadcast %cst_28 : f32 to vector<8x128xf32>
    %39 = arith.mulf %38, %37 : vector<8x128xf32>
    %40 = arith.maximumf %37, %39 : vector<8x128xf32>
    %c4 = arith.constant 4 : index
    %c0_29 = arith.constant 0 : index
    %c0_30 = arith.constant 0 : index
    %41 = vector.load %arg2[%c4, %c0_29, %c0_30] : memref<6x128x128xf32, #tpu.memory_space<vmem>>, vector<1x128x128xf32>
    %42 = vector.shape_cast %41 : vector<1x128x128xf32> to vector<128x128xf32>
    %cst_31 = arith.constant dense<0.000000e+00> : vector<8x128xf32>
    %43 = tpu.matmul %40, %42, %cst_31 {dimension_numbers = #tpu.dot_dimension_numbers<[1], [0], [0], [1], [0, 0, 1, 1], [], []>} : vector<8x128xf32>, vector<128x128xf32>, vector<8x128xf32> -> vector<8x128xf32>
    %c4_32 = arith.constant 4 : index
    %c0_33 = arith.constant 0 : index
    %c0_34 = arith.constant 0 : index
    %44 = vector.load %arg3[%c4_32, %c0_33, %c0_34] : memref<6x1x128xf32, #tpu.memory_space<vmem>>, vector<1x1x128xf32>
    %45 = vector.shape_cast %44 : vector<1x1x128xf32> to vector<1x128xf32>
    %46 = vector.broadcast %45 : vector<1x128xf32> to vector<8x128xf32>
    %47 = arith.addf %43, %46 : vector<8x128xf32>
    %cst_35 = arith.constant 0.00999999977 : f32
    %48 = vector.broadcast %cst_35 : f32 to vector<8x128xf32>
    %49 = arith.mulf %48, %47 : vector<8x128xf32>
    %50 = arith.maximumf %47, %49 : vector<8x128xf32>
    %c5 = arith.constant 5 : index
    %c0_36 = arith.constant 0 : index
    %c0_37 = arith.constant 0 : index
    %51 = vector.load %arg2[%c5, %c0_36, %c0_37] : memref<6x128x128xf32, #tpu.memory_space<vmem>>, vector<1x128x128xf32>
    %52 = vector.shape_cast %51 : vector<1x128x128xf32> to vector<128x128xf32>
    %cst_38 = arith.constant dense<0.000000e+00> : vector<8x128xf32>
    %53 = tpu.matmul %50, %52, %cst_38 {dimension_numbers = #tpu.dot_dimension_numbers<[1], [0], [0], [1], [0, 0, 1, 1], [], []>} : vector<8x128xf32>, vector<128x128xf32>, vector<8x128xf32> -> vector<8x128xf32>
    %c5_39 = arith.constant 5 : index
    %c0_40 = arith.constant 0 : index
    %c0_41 = arith.constant 0 : index
    %54 = vector.load %arg3[%c5_39, %c0_40, %c0_41] : memref<6x1x128xf32, #tpu.memory_space<vmem>>, vector<1x1x128xf32>
    %55 = vector.shape_cast %54 : vector<1x1x128xf32> to vector<1x128xf32>
    %56 = vector.broadcast %55 : vector<1x128xf32> to vector<8x128xf32>
    %57 = arith.addf %53, %56 : vector<8x128xf32>
    %58 = arith.negf %57 : vector<8x128xf32>
    %59 = math.exp %58 : vector<8x128xf32>
    %cst_42 = arith.constant 1.000000e+00 : f32
    %60 = vector.broadcast %cst_42 : f32 to vector<8x128xf32>
    %61 = arith.addf %60, %59 : vector<8x128xf32>
    %62 = arith.divf %60, %61 : vector<8x128xf32>
    %c0_43 = arith.constant 0 : index
    %c0_44 = arith.constant 0 : index
    %63 = vector.load %arg4[%c0_43, %c0_44] : memref<8x128xf32, #tpu.memory_space<vmem>>, vector<8x128xf32>
    tpu.vector_store %arg4[%c0_43, %c0_44], %62 {strides = array<i32>} : memref<8x128xf32, #tpu.memory_space<vmem>>, vector<8x128xf32>,
    return
  }
  func.func @transform_0(%arg0: i32) -> (i32, i32) {
    %c0_i32 = arith.constant 0 : i32
    %c0_i32_0 = arith.constant 0 : i32
    return %arg0, %c0_i32 : i32, i32
  }
  func.func @transform_1(%arg0: i32) -> (i32, i32, i32) {
    %c0_i32 = arith.constant 0 : i32
    %c0_i32_0 = arith.constant 0 : i32
    %c0_i32_1 = arith.constant 0 : i32
    %c0_i32_2 = arith.constant 0 : i32
    return %c0_i32, %c0_i32_0, %c0_i32_1 : i32, i32, i32
  }
  func.func @transform_2(%arg0: i32) -> (i32, i32, i32) {
    %c0_i32 = arith.constant 0 : i32
    %c0_i32_0 = arith.constant 0 : i32
    %c0_i32_1 = arith.constant 0 : i32
    %c0_i32_2 = arith.constant 0 : i32
    return %c0_i32, %c0_i32_0, %c0_i32_1 : i32, i32, i32
  }
  func.func @transform_3(%arg0: i32) -> (i32, i32) {
    %c0_i32 = arith.constant 0 : i32
    %c0_i32_0 = arith.constant 0 : i32
    return %arg0, %c0_i32 : i32, i32
  }
}

</mosaic_0001>

<bundles_post_ra>
// kernel: autoencoder_forward.1
= control target key start
LH: loop header
LB: loop body
LE: loop exit
PB: predicated region body
PF: predicated region fallthrough
CT: control target
= control target key end

     0   :  { %8 = vsyncpa [#allocation3], 0  ;;  %s1121_s12 = smov [#allocation2]   ;;  %s1243_s0 = inlined_call_operand.vmem [shape: f32[8,128], index: 0, kind: input, shape index: {}]   ;;  %s1244_s1 = inlined_call_operand.hbm [shape: f32[6,128,128], index: 1, kind: input, shape index: {}]   ;;  %s1245_s2 = inlined_call_operand.vmem [shape: f32[6,1,128], index: 2, kind: input, shape index: {}]   ;;  %s1246_s3 = inlined_call_operand.vmem [shape: f32[8,128], index: 3, kind: output, shape index: {}]  }
   0x1   :  { %s16_s13 = sshll.u32 %s1121_s12, 4  ;;  %s1097_s16 = scalar_lea.hbm %s1244_s1, 12288  ;;  %s17_s13 = int_to_ptr.vmem [resolvable:$true] %s16_s13 }
   0x2   :  { %p1098_p0 = scmp.ne.s32.totalorder %s1244_s1, %s1097_s16  ;;  %p1101_p1 = scmp.lt.u32.totalorder %s1097_s16, %s1244_s1 }
   0x4   :  { %p1103_p2 = pnand %p1101_p1, %p1098_p0 }
   0x6   :  { %1106 = shalt.err (!%p1103_p2)
}
   0x7   :  { %s1107_s21 = scalar_lea.vmem %s17_s13, 12288  ;;  %p1112_p4 = scmp.lt.s32.totalorder %s17_s13, %s17_s13 }
   0x8   :  { %p1108_p3 = scmp.ne.s32.totalorder %s17_s13, %s1107_s21  ;;  %p1113_p5 = scmp.lt.s32.totalorder %s1107_s21, %s1107_s21 }
   0xa   :  { %p1114_p6 = por %p1113_p5, %p1112_p4 }
   0xc   :  { %p1115_p7 = pnand %p1114_p6, %p1108_p3 }
   0xe   :  { %1118 = shalt.err (!%p1115_p7)
}
   0xf   :  { %s1122_s22 = smov 128   ;;  %s1123_s23 = smov 8  }
  0x10   :  { %22 = dma.hbm_to_vmem [thread:$0]  %s1244_s1, 12288, %s17_s13, [#allocation3], %s1122_s22, %s1122_s22, %s1123_s23  }
  0x11   :  { %1119 = dma.done.wait [#allocation3], 12288  }
  0x12   :  { %1120 = vsyncadd [#allocation3], 4294955008  ;;  %v1124_v0 = vmov 0.0|0.0   ;;  %vm1125_vm0 = vmmov 0   ;;  %v1126_v1 = vmov 0.0   ;;  %v29_v2 = vld [vmem:[#allocation2] sm:$0xff] }
  0x13   :  { %943 = vmatprep.subr.bf16.mxu0 %v1124_v0  ;;  %765 = vmatprep.mubr.msk.f32.mxu0 %vm1125_vm0, %v1126_v1  ;;  %v30_v3 = vld [vmem:[#allocation2 + $0x8] sm:$0xff]  ;;  %v31_v4 = vld [vmem:[#allocation2 + $0x10] sm:$0xff]  ;;  %v32_v6 = vld [vmem:[#allocation2 + $0x18] sm:$0xff] }
  0x14   :  { %967 = vmatprep.subr.bf16.mxu1 %v1124_v0  ;;  %800 = vmatprep.mubr.msk.f32.mxu1 %vm1125_vm0, %v1126_v1  ;;  %v944_v5 = vpack.c.bf16 %v30_v3, %v29_v2  ;;  %v947_v7 = vpack.c.bf16 %v32_v6, %v31_v4  ;;  %v33_v8 = vld [vmem:[#allocation2 + $0x20] sm:$0xff]  ;;  %v34_v9 = vld [vmem:[#allocation2 + $0x28] sm:$0xff]  ;;  %v127_v12 = vld [vmem:[#allocation2 + $0x90] sm:$0xff] }
  0x15   :  { %v125_v10 = vld [vmem:[#allocation2 + $0x80] sm:$0xff]  ;;  %v126_v11 = vld [vmem:[#allocation2 + $0x88] sm:$0xff]  ;;  %v128_v13 = vld [vmem:[#allocation2 + $0x98] sm:$0xff]  ;;  %v950_v14 = vpack.c.bf16 %v34_v9, %v33_v8 }
  0x16   :  { %945 = vmatpush3.bf16.msra.mxu0 %v944_v5  ;;  %v968_v15 = vpack.c.bf16 %v126_v11, %v125_v10  ;;  %v35_v16 = vld [vmem:[#allocation2 + $0x30] sm:$0xff]  ;;  %v36_v17 = vld [vmem:[#allocation2 + $0x38] sm:$0xff]  ;;  %v971_v18 = vpack.c.bf16 %v128_v13, %v127_v12  ;;  %v129_v19 = vld [vmem:[#allocation2 + $0xa0] sm:$0xff] }
  0x17   :  { %946 = vmatprep.subr.bf16.mxu0 %v1124_v0  ;;  %v130_v20 = vld [vmem:[#allocation2 + $0xa8] sm:$0xff]  ;;  %v953_v21 = vpack.c.bf16 %v36_v17, %v35_v16  ;;  %v37_v22 = vld [vmem:[#allocation2 + $0x40] sm:$0xff]  ;;  %v131_v25 = vld [vmem:[#allocation2 + $0xb0] sm:$0xff] }
  0x18   :  { %969 = vmatpush3.bf16.msra.mxu1 %v968_v15  ;;  %v38_v23 = vld [vmem:[#allocation2 + $0x48] sm:$0xff]  ;;  %v974_v24 = vpack.c.bf16 %v130_v20, %v129_v19  ;;  %v132_v26 = vld [vmem:[#allocation2 + $0xb8] sm:$0xff]  ;;  %v39_v28 = vld [vmem:[#allocation2 + $0x50] sm:$0xff] }
  0x19   :  { %970 = vmatprep.subr.bf16.mxu1 %v1124_v0  ;;  %v956_v27 = vpack.c.bf16 %v38_v23, %v37_v22  ;;  %v40_v29 = vld [vmem:[#allocation2 + $0x58] sm:$0xff]  ;;  %v977_v30 = vpack.c.bf16 %v132_v26, %v131_v25  ;;  %v133_v31 = vld [vmem:[#allocation2 + $0xc0] sm:$0xff]  ;;  %v134_v32 = vld [vmem:[#allocation2 + $0xc8] sm:$0xff] }
  0x1a   :  { %948 = vmatpush3.bf16.msra.mxu0 %v947_v7  ;;  %v959_v33 = vpack.c.bf16 %v40_v29, %v39_v28  ;;  %v41_v34 = vld [vmem:[#allocation2 + $0x60] sm:$0xff]  ;;  %v42_v35 = vld [vmem:[#allocation2 + $0x68] sm:$0xff]  ;;  %v980_v36 = vpack.c.bf16 %v134_v32, %v133_v31  ;;  %v135_v37 = vld [vmem:[#allocation2 + $0xd0] sm:$0xff] }
  0x1b   :  { %949 = vmatprep.subr.bf16.mxu0 %v1124_v0  ;;  %v136_v38 = vld [vmem:[#allocation2 + $0xd8] sm:$0xff]  ;;  %v962_v39 = vpack.c.bf16 %v42_v35, %v41_v34  ;;  %v43_v40 = vld [vmem:[#allocation2 + $0x70] sm:$0xff]  ;;  %v28_v44 = vld [vmem:[%s1243_s0] sm:$0xff] }
  0x1c   :  { %972 = vmatpush3.bf16.msra.mxu1 %v971_v18  ;;  %v44_v41 = vld [vmem:[#allocation2 + $0x78] sm:$0xff]  ;;  %v983_v42 = vpack.c.bf16 %v136_v38, %v135_v37  ;;  %v137_v45 = vld [vmem:[#allocation2 + $0xe0] sm:$0xff]  ;;  %v138_v46 = vld [vmem:[#allocation2 + $0xe8] sm:$0xff] }
  0x1d   :  { %973 = vmatprep.subr.bf16.mxu1 %v1124_v0  ;;  %v965_v43 = vpack.c.bf16 %v44_v41, %v43_v40  ;;  %v986_v47 = vpack.c.bf16 %v138_v46, %v137_v45  ;;  %v139_v48 = vld [vmem:[#allocation2 + $0xf0] sm:$0xff]  ;;  %v140_v49 = vld [vmem:[#allocation2 + $0xf8] sm:$0xff]  ;;  %v222_v51 = vld [vmem:[#allocation2 + $0x100] sm:$0xff] }
  0x1e   :  { %951 = vmatpush3.bf16.msra.mxu0 %v950_v14  ;;  %v989_v50 = vpack.c.bf16 %v140_v49, %v139_v48  ;;  %v223_v52 = vld [vmem:[#allocation2 + $0x108] sm:$0xff]  ;;  %v224_v53 = vld [vmem:[#allocation2 + $0x110] sm:$0xff]  ;;  %v225_v55 = vld [vmem:[#allocation2 + $0x118] sm:$0xff] }
  0x1f   :  { %952 = vmatprep.subr.bf16.mxu0 %v1124_v0  ;;  %v992_v54 = vpack.c.bf16 %v223_v52, %v222_v51  ;;  %v995_v56 = vpack.c.bf16 %v225_v55, %v224_v53  ;;  %v226_v57 = vld [vmem:[#allocation2 + $0x120] sm:$0xff]  ;;  %v227_v58 = vld [vmem:[#allocation2 + $0x128] sm:$0xff]  ;;  %v228_v60 = vld [vmem:[#allocation2 + $0x130] sm:$0xff] }
  0x20   :  { %975 = vmatpush3.bf16.msra.mxu1 %v974_v24  ;;  %v998_v59 = vpack.c.bf16 %v227_v58, %v226_v57  ;;  %v229_v61 = vld [vmem:[#allocation2 + $0x138] sm:$0xff]  ;;  %v230_v63 = vld [vmem:[#allocation2 + $0x140] sm:$0xff]  ;;  %v231_v2 = vld [vmem:[#allocation2 + $0x148] sm:$0xff] }
  0x21   :  { %976 = vmatprep.subr.bf16.mxu1 %v1124_v0  ;;  %v1001_v62 = vpack.c.bf16 %v229_v61, %v228_v60  ;;  %v1004_v3 = vpack.c.bf16 %v231_v2, %v230_v63  ;;  %v232_v4 = vld [vmem:[#allocation2 + $0x150] sm:$0xff]  ;;  %v233_v5 = vld [vmem:[#allocation2 + $0x158] sm:$0xff]  ;;  %v619_v7 = vld [vmem:[%s1245_s2] ss:$0 sm:$0xff] }
  0x22   :  { %954 = vmatpush3.bf16.msra.mxu0 %v953_v21  ;;  %v1007_v6 = vpack.c.bf16 %v233_v5, %v232_v4  ;;  %v234_v13 = vld [vmem:[#allocation2 + $0x160] sm:$0xff]  ;;  %v235_v14 = vld [vmem:[#allocation2 + $0x168] sm:$0xff]  ;;  %v236_v16 = vld [vmem:[#allocation2 + $0x170] sm:$0xff] }
  0x23   :  { %955 = vmatprep.subr.bf16.mxu0 %v1124_v0  ;;  %v1010_v15 = vpack.c.bf16 %v235_v14, %v234_v13  ;;  %v237_v17 = vld [vmem:[#allocation2 + $0x178] sm:$0xff]  ;;  %v319_v19 = vld [vmem:[#allocation2 + $0x180] sm:$0xff]  ;;  %v320_v20 = vld [vmem:[#allocation2 + $0x188] sm:$0xff] }
  0x24   :  { %978 = vmatpush3.bf16.msra.mxu1 %v977_v30  ;;  %v1013_v18 = vpack.c.bf16 %v237_v17, %v236_v16  ;;  %v321_v21 = vld [vmem:[#allocation2 + $0x190] sm:$0xff]  ;;  %v1016_v22 = vpack.c.bf16 %v320_v20, %v319_v19  ;;  %v322_v23 = vld [vmem:[#allocation2 + $0x198] sm:$0xff]  ;;  %v323_v25 = vld [vmem:[#allocation2 + $0x1a0] sm:$0xff] }
  0x25   :  { %979 = vmatprep.subr.bf16.mxu1 %v1124_v0  ;;  %v1019_v24 = vpack.c.bf16 %v322_v23, %v321_v21  ;;  %v324_v26 = vld [vmem:[#allocation2 + $0x1a8] sm:$0xff]  ;;  %v325_v28 = vld [vmem:[#allocation2 + $0x1b0] sm:$0xff]  ;;  %v326_v29 = vld [vmem:[#allocation2 + $0x1b8] sm:$0xff] }
  0x26   :  { %957 = vmatpush3.bf16.msra.mxu0 %v956_v27  ;;  %v1022_v27 = vpack.c.bf16 %v324_v26, %v323_v25  ;;  %v1025_v30 = vpack.c.bf16 %v326_v29, %v325_v28  ;;  %v327_v31 = vld [vmem:[#allocation2 + $0x1c0] sm:$0xff]  ;;  %v328_v32 = vld [vmem:[#allocation2 + $0x1c8] sm:$0xff]  ;;  %v329_v34 = vld [vmem:[#allocation2 + $0x1d0] sm:$0xff] }
  0x27   :  { %958 = vmatprep.subr.bf16.mxu0 %v1124_v0  ;;  %v330_v35 = vld [vmem:[#allocation2 + $0x1d8] sm:$0xff]  ;;  %v621_v37 = vld [vmem:[%s1245_s2 + $0x1] ss:$0 sm:$0xff]  ;;  %v333_v46 = vld [vmem:[#allocation2 + $0x1f0] sm:$0xff] }
  0x28   :  { %981 = vmatpush3.bf16.msra.mxu1 %v980_v36  ;;  %v1031_v36 = vpack.c.bf16 %v330_v35, %v329_v34  ;;  %v416_v49 = vld [vmem:[#allocation2 + $0x200] sm:$0xff]  ;;  %v418_v51 = vld [vmem:[#allocation2 + $0x210] sm:$0xff]  ;;  %v419_v53 = vld [vmem:[#allocation2 + $0x218] sm:$0xff] }
  0x29   :  { %982 = vmatprep.subr.bf16.mxu1 %v1124_v0  ;;  %v420_v55 = vld [vmem:[#allocation2 + $0x220] sm:$0xff]  ;;  %v422_v58 = vld [vmem:[#allocation2 + $0x230] sm:$0xff]  ;;  %v516_v21 = vld [vmem:[#allocation2 + $0x298] sm:$0xff] }
  0x2a   :  { %960 = vmatpush3.bf16.msra.mxu0 %v959_v33  ;;  %v1028_v33 = vpack.c.bf16 %v328_v32, %v327_v31  ;;  %v424_v61 = vld [vmem:[#allocation2 + $0x240] sm:$0xff]  ;;  %v426_v2 = vld [vmem:[#allocation2 + $0x250] sm:$0xff]  ;;  %v518_v23 = vld [vmem:[#allocation2 + $0x2a8] sm:$0xff] }
  0x2b   :  { %961 = vmatprep.subr.bf16.mxu0 %v1124_v0  ;;  %v623_v5 = vld [vmem:[%s1245_s2 + $0x2] ss:$0 sm:$0xff]  ;;  %v430_v14 = vld [vmem:[#allocation2 + $0x270] sm:$0xff]  ;;  %v520_v26 = vld [vmem:[#allocation2 + $0x2b8] sm:$0xff] }
  0x2c   :  { %984 = vmatpush3.bf16.msra.mxu1 %v983_v42  ;;  %v513_v17 = vld [vmem:[#allocation2 + $0x280] sm:$0xff]  ;;  %v515_v19 = vld [vmem:[#allocation2 + $0x290] sm:$0xff]  ;;  %v522_v29 = vld [vmem:[#allocation2 + $0x2c8] sm:$0xff] }
  0x2d   :  { %985 = vmatprep.subr.bf16.mxu1 %v1124_v0  ;;  %v519_v25 = vld [vmem:[#allocation2 + $0x2b0] sm:$0xff]  ;;  %v521_v28 = vld [vmem:[#allocation2 + $0x2c0] sm:$0xff]  ;;  %v524_v32 = vld [vmem:[#allocation2 + $0x2d8] sm:$0xff] }
  0x2e   :  { %963 = vmatpush3.bf16.msra.mxu0 %v962_v39  ;;  %v523_v31 = vld [vmem:[#allocation2 + $0x2d0] sm:$0xff]  ;;  %v625_v34 = vld [vmem:[%s1245_s2 + $0x3] ss:$0 sm:$0xff] }
  0x2f   :  { %964 = vmatprep.subr.bf16.mxu0 %v1124_v0 }
  0x30   :  { %987 = vmatpush3.bf16.msra.mxu1 %v986_v47  ;;  %v334_v47 = vld [vmem:[#allocation2 + $0x1f8] sm:$0xff] }
  0x31   :  { %988 = vmatprep.subr.bf16.mxu1 %v1124_v0  ;;  %v1037_v48 = vpack.c.bf16 %v334_v47, %v333_v46  ;;  %v627_v46 = vld [vmem:[%s1245_s2 + $0x4] ss:$0 sm:$0xff] }
  0x32   :  { %966 = vmatpush3.bf16.msra.mxu0 %v965_v43  ;;  %v331_v43 = vld [vmem:[#allocation2 + $0x1e0] sm:$0xff] }
  0x33   :  { %991 = vmatprep.subr.bf16.mxu0 %v1124_v0 }
  0x34   :  { %990 = vmatpush3.bf16.msra.mxu1 %v989_v50  ;;  %v417_v50 = vld [vmem:[#allocation2 + $0x208] sm:$0xff] }
  0x35   :  { %766 = vmatmul.mubr.f32.vlgmr.msra.gmra.mrb[0].mxu0 %v28_v44  ;;  %1015 = vmatprep.subr.bf16.mxu1 %v1124_v0  ;;  %v332_v44 = vld [vmem:[#allocation2 + $0x1e8] sm:$0xff]  ;;  %v1040_v52 = vpack.c.bf16 %v417_v50, %v416_v49 }
  0x36   :  { %835 = vmatprep.mubr.msk.f32.mxu0 %vm1125_vm0, %v1126_v1  ;;  %993 = vmatpush3.bf16.msra.mxu0 %v992_v54  ;;  %v1034_v45 = vpack.c.bf16 %v332_v44, %v331_v43  ;;  %v1043_v54 = vpack.c.bf16 %v419_v53, %v418_v51  ;;  %v527_v43 = vld [vmem:[#allocation2 + $0x2f0] sm:$0xff]  ;;  %v528_v44 = vld [vmem:[#allocation2 + $0x2f8] sm:$0xff] }
  0x37   :  { %994 = vmatprep.subr.bf16.mxu0 %v1124_v0 }
  0x3a   :  { %996 = vmatpush3.bf16.msra.mxu0 %v995_v56  ;;  %v421_v56 = vld [vmem:[#allocation2 + $0x228] sm:$0xff] }
  0x3b   :  { %997 = vmatprep.subr.bf16.mxu0 %v1124_v0  ;;  %v1046_v57 = vpack.c.bf16 %v421_v56, %v420_v55 }
  0x3e   :  { %999 = vmatpush3.bf16.msra.mxu0 %v998_v59  ;;  %v423_v59 = vld [vmem:[#allocation2 + $0x238] sm:$0xff] }
  0x3f   :  { %1000 = vmatprep.subr.bf16.mxu0 %v1124_v0  ;;  %v1049_v60 = vpack.c.bf16 %v423_v59, %v422_v58 }
  0x42   :  { %1002 = vmatpush3.bf16.msra.mxu0 %v1001_v62  ;;  %v425_v62 = vld [vmem:[#allocation2 + $0x248] sm:$0xff] }
  0x43   :  { %1003 = vmatprep.subr.bf16.mxu0 %v1124_v0  ;;  %v1052_v63 = vpack.c.bf16 %v425_v62, %v424_v61 }
  0x46   :  { %1005 = vmatpush3.bf16.msra.mxu0 %v1004_v3  ;;  %v427_v3 = vld [vmem:[#allocation2 + $0x258] sm:$0xff] }
  0x47   :  { %1006 = vmatprep.subr.bf16.mxu0 %v1124_v0  ;;  %v1055_v4 = vpack.c.bf16 %v427_v3, %v426_v2 }
  0x4a   :  { %1008 = vmatpush3.bf16.msra.mxu0 %v1007_v6 }
  0x4b   :  { %1009 = vmatprep.subr.bf16.mxu0 %v1124_v0 }
  0x4e   :  { %1011 = vmatpush3.bf16.msra.mxu0 %v1010_v15  ;;  %v431_v15 = vld [vmem:[#allocation2 + $0x278] sm:$0xff] }
  0x4f   :  { %1012 = vmatprep.subr.bf16.mxu0 %v1124_v0  ;;  %v1061_v16 = vpack.c.bf16 %v431_v15, %v430_v14 }
  0x52   :  { %1014 = vmatpush3.bf16.msra.mxu0 %v1013_v18  ;;  %v514_v18 = vld [vmem:[#allocation2 + $0x288] sm:$0xff] }
  0x53   :  { %1039 = vmatprep.subr.bf16.mxu0 %v1124_v0  ;;  %v1064_v20 = vpack.c.bf16 %v514_v18, %v513_v17 }
 0x108   :  { %v118_v8 = vpop.f32.mrb[0].mxu0 }
 0x109   :  { %v119_v9 = vadd.f32 %v619_v7, %v118_v8  ;;  %v767_v10 = vpop.f32.mrb[1].mxu0 }
 0x10b   :  { %v122_v11 = vmul.f32 0.01, %v119_v9 }
 0x10d   :  { %v123_v12 = vmax.f32 %v119_v9, %v122_v11  ;;  %v428_v11 = vld [vmem:[#allocation2 + $0x260] sm:$0xff] }
 0x10f   :  { %801 = vmatmul.mubr.f32.vlgmr.msra.gmra.mrb[0].mxu1 %v123_v12  ;;  %v429_v12 = vld [vmem:[#allocation2 + $0x268] sm:$0xff] }
 0x110   :  { %870 = vmatprep.mubr.msk.f32.mxu1 %vm1125_vm0, %v1126_v1  ;;  %1017 = vmatpush3.bf16.msra.mxu1 %v1016_v22  ;;  %v1058_v13 = vpack.c.bf16 %v429_v12, %v428_v11  ;;  %v1067_v22 = vpack.c.bf16 %v516_v21, %v515_v19 }
 0x111   :  { %1018 = vmatprep.subr.bf16.mxu1 %v1124_v0 }
 0x114   :  { %1020 = vmatpush3.bf16.msra.mxu1 %v1019_v24 }
 0x115   :  { %1021 = vmatprep.subr.bf16.mxu1 %v1124_v0 }
 0x118   :  { %1023 = vmatpush3.bf16.msra.mxu1 %v1022_v27  ;;  %v1073_v27 = vpack.c.bf16 %v520_v26, %v519_v25 }
 0x119   :  { %1024 = vmatprep.subr.bf16.mxu1 %v1124_v0 }
 0x11c   :  { %1026 = vmatpush3.bf16.msra.mxu1 %v1025_v30  ;;  %v1076_v30 = vpack.c.bf16 %v522_v29, %v521_v28 }
 0x11d   :  { %1027 = vmatprep.subr.bf16.mxu1 %v1124_v0 }
 0x120   :  { %1029 = vmatpush3.bf16.msra.mxu1 %v1028_v33  ;;  %v1079_v33 = vpack.c.bf16 %v524_v32, %v523_v31 }
 0x121   :  { %1030 = vmatprep.subr.bf16.mxu1 %v1124_v0 }
 0x124   :  { %1032 = vmatpush3.bf16.msra.mxu1 %v1031_v36 }
 0x125   :  { %1033 = vmatprep.subr.bf16.mxu1 %v1124_v0 }
 0x128   :  { %1035 = vmatpush3.bf16.msra.mxu1 %v1034_v45  ;;  %v1085_v45 = vpack.c.bf16 %v528_v44, %v527_v43 }
 0x129   :  { %1036 = vmatprep.subr.bf16.mxu1 %v1124_v0 }
 0x12c   :  { %1038 = vmatpush3.bf16.msra.mxu1 %v1037_v48 }
 0x12d   :  { %1063 = vmatprep.subr.bf16.mxu1 %v1124_v0 }
 0x1e2   :  { %v215_v38 = vpop.f32.mrb[0].mxu1 }
 0x1e3   :  { %v216_v39 = vadd.f32 %v621_v37, %v215_v38  ;;  %v802_v40 = vpop.f32.mrb[1].mxu1 }
 0x1e4   :  { %v525_v40 = vld [vmem:[#allocation2 + $0x2e0] sm:$0xff] }
 0x1e5   :  { %v219_v41 = vmul.f32 0.01, %v216_v39 }
 0x1e7   :  { %v220_v42 = vmax.f32 %v216_v39, %v219_v41  ;;  %v526_v41 = vld [vmem:[#allocation2 + $0x2e8] sm:$0xff] }
 0x1e9   :  { %836 = vmatmul.mubr.f32.vlgmr.msra.gmra.mrb[2].mxu0 %v220_v42  ;;  %v1082_v42 = vpack.c.bf16 %v526_v41, %v525_v40 }
 0x1ea   :  { %905 = vmatprep.mubr.msk.f32.mxu0 %vm1125_vm0, %v1126_v1  ;;  %1041 = vmatpush3.bf16.msra.mxu0 %v1040_v52  ;;  %v629_v52 = vld [vmem:[%s1245_s2 + $0x5] ss:$0 sm:$0xff] }
 0x1eb   :  { %1042 = vmatprep.subr.bf16.mxu0 %v1124_v0 }
 0x1ee   :  { %1044 = vmatpush3.bf16.msra.mxu0 %v1043_v54 }
 0x1ef   :  { %1045 = vmatprep.subr.bf16.mxu0 %v1124_v0 }
 0x1f2   :  { %1047 = vmatpush3.bf16.msra.mxu0 %v1046_v57 }
 0x1f3   :  { %1048 = vmatprep.subr.bf16.mxu0 %v1124_v0 }
 0x1f6   :  { %1050 = vmatpush3.bf16.msra.mxu0 %v1049_v60 }
 0x1f7   :  { %1051 = vmatprep.subr.bf16.mxu0 %v1124_v0 }
 0x1fa   :  { %1053 = vmatpush3.bf16.msra.mxu0 %v1052_v63 }
 0x1fb   :  { %1054 = vmatprep.subr.bf16.mxu0 %v1124_v0 }
 0x1fe   :  { %1056 = vmatpush3.bf16.msra.mxu0 %v1055_v4 }
 0x1ff   :  { %1057 = vmatprep.subr.bf16.mxu0 %v1124_v0 }
 0x202   :  { %1059 = vmatpush3.bf16.msra.mxu0 %v1058_v13 }
 0x203   :  { %1060 = vmatprep.subr.bf16.mxu0 %v1124_v0 }
 0x206   :  { %1062 = vmatpush3.bf16.msra.mxu0 %v1061_v16 }
 0x2bc   :  { %v312_v6 = vpop.f32.mrb[2].mxu0 }
 0x2bd   :  { %v313_v7 = vadd.f32 %v623_v5, %v312_v6  ;;  %v837_v8 = vpop.f32.mrb[3].mxu0 }
 0x2bf   :  { %v316_v9 = vmul.f32 0.01, %v313_v7 }
 0x2c1   :  { %v317_v10 = vmax.f32 %v313_v7, %v316_v9 }
 0x2c3   :  { %871 = vmatmul.mubr.f32.vlgmr.msra.gmra.mrb[2].mxu1 %v317_v10 }
 0x2c4   :  { %940 = vmatprep.mubr.msk.f32.mxu1 %vm1125_vm0, %v1126_v1  ;;  %1065 = vmatpush3.bf16.msra.mxu1 %v1064_v20  ;;  %v517_v1 = vld [vmem:[#allocation2 + $0x2a0] sm:$0xff] }
 0x2c5   :  { %1066 = vmatprep.subr.bf16.mxu1 %v1124_v0  ;;  %v1070_v24 = vpack.c.bf16 %v518_v23, %v517_v1 }
 0x2c8   :  { %1068 = vmatpush3.bf16.msra.mxu1 %v1067_v22 }
 0x2c9   :  { %1069 = vmatprep.subr.bf16.mxu1 %v1124_v0 }
 0x2cc   :  { %1071 = vmatpush3.bf16.msra.mxu1 %v1070_v24 }
 0x2cd   :  { %1072 = vmatprep.subr.bf16.mxu1 %v1124_v0 }
 0x2d0   :  { %1074 = vmatpush3.bf16.msra.mxu1 %v1073_v27 }
 0x2d1   :  { %1075 = vmatprep.subr.bf16.mxu1 %v1124_v0 }
 0x2d4   :  { %1077 = vmatpush3.bf16.msra.mxu1 %v1076_v30 }
 0x2d5   :  { %1078 = vmatprep.subr.bf16.mxu1 %v1124_v0 }
 0x2d8   :  { %1080 = vmatpush3.bf16.msra.mxu1 %v1079_v33 }
 0x2d9   :  { %1081 = vmatprep.subr.bf16.mxu1 %v1124_v0 }
 0x2dc   :  { %1083 = vmatpush3.bf16.msra.mxu1 %v1082_v42 }
 0x2dd   :  { %1084 = vmatprep.subr.bf16.mxu1 %v1124_v0 }
 0x2e0   :  { %1086 = vmatpush3.bf16.msra.mxu1 %v1085_v45 }
 0x396   :  { %v409_v35 = vpop.f32.mrb[2].mxu1 }
 0x397   :  { %v410_v36 = vadd.f32 %v625_v34, %v409_v35  ;;  %v872_v37 = vpop.f32.mrb[3].mxu1 }
 0x399   :  { %v413_v38 = vmul.f32 0.01, %v410_v36 }
 0x39b   :  { %v414_v39 = vmax.f32 %v410_v36, %v413_v38 }
 0x39d   :  { %906 = vmatmul.mubr.f32.vlgmr.msra.gmra.mrb[4].mxu0 %v414_v39 }
 0x470   :  { %v506_v47 = vpop.f32.mrb[4].mxu0 }
 0x471   :  { %v507_v48 = vadd.f32 %v627_v46, %v506_v47  ;;  %v907_v49 = vpop.f32.mrb[5].mxu0 }
 0x473   :  { %v510_v50 = vmul.f32 0.01, %v507_v48 }
 0x475   :  { %v511_v51 = vmax.f32 %v507_v48, %v510_v50 }
 0x477   :  { %941 = vmatmul.mubr.f32.vlgmr.msra.gmra.mrb[4].mxu1 %v511_v51 }
 0x54a   :  { %v603_v53 = vpop.f32.mrb[4].mxu1 }
 0x54b   :  { %v604_v0 = vadd.f32 %v629_v52, %v603_v53  ;;  %v942_v54 = vpop.f32.mrb[5].mxu1 }
 0x54d   :  { %v630_v55 = vmul.f32 -1.442695, %v604_v0 }
 0x54f   :  { %1093 = vpow2.f32 %v630_v55 }
 0x559   :  { %v1094_v56 = vpop.eup %1093 }
 0x55a   :  { %v610_v57 = vadd.f32 1.0, %v1094_v56 }
 0x55c   :  { %1095 = vrcp.f32 %v610_v57 }
 0x566   :  { %v1096_v58 = vpop.eup %1095 }
 0x567   :  { %613 = vst [vmem:[%s1246_s3] sm:$0xff] %v1096_v58 }
 0x568   :  { %618 = vsyncpa [#allocation3], 1 }

</bundles_post_ra>
